<compile_context>
chip_gen: v7x
topology: tpu7x:2x2x1
jax: 0.10.0
libtpu: 0.0.40
codegen_flags: <defaults>
</compile_context>

<pallas_src>
import functools

import jax
import jax.numpy as jnp
from jax.experimental import pallas as pl
from jax.experimental.pallas import tpu as pltpu

_MIB = 1024 * 1024


def _linear_kernel(x_ref, w_ref, b_ref, o_ref):
    # x_ref: [tm, F_in], w_ref: [F_in, tn], b_ref: [1, tn] f32, o_ref: [tm, tn]
    acc = jnp.dot(x_ref[...], w_ref[...], preferred_element_type=jnp.float32)
    o_ref[...] = (acc + b_ref[...]).astype(o_ref.dtype)


def _linear_kernel_ktiled(x_ref, w_ref, b_ref, o_ref, acc_ref):
    # Same linear, but F_in is tiled along the last ("arbitrary") grid axis.
    k = pl.program_id(2)

    @pl.when(k == 0)
    def _init():
        acc_ref[...] = jnp.zeros_like(acc_ref)

    acc_ref[...] += jnp.dot(x_ref[...], w_ref[...],
                            preferred_element_type=jnp.float32)

    @pl.when(k == pl.num_programs(2) - 1)
    def _store():
        o_ref[...] = (acc_ref[...] + b_ref[...]).astype(o_ref.dtype)


def _round_up(v, m):
    return ((v + m - 1) // m) * m


def _vmem_plan():
    """Return (tile byte budget, vmem_limit_bytes) sized per TPU generation."""
    try:
        cap = int(pltpu.get_tpu_info().vmem_capacity_bytes)
    except Exception:  # unknown device / interpret mode
        cap = 0
    if cap >= 96 * _MIB:        # v5e / v6e class: 128 MiB physical VMEM
        return 48 * _MIB, 64 * _MIB
    if cap >= 48 * _MIB:        # v7x class: 64 MiB physical per TensorCore
        return 24 * _MIB, 32 * _MIB
    return 14 * _MIB, None      # conservative: fits every default scoped limit


def _fit_tiles(n, f_in, f_out_p, x_isz, w_isz, out_isz, tile_n, budget):
    """Pick (tm, tn, tk) under the VMEM budget.

    Priority (per review): keep tn == f_out_p (x read exactly once) until tm
    has been reduced to ~512; then shrink tn; then tm down to 256; finally
    K-tile F_in (only with exact divisibility, so no garbage enters the
    contraction).
    """
    # packed-sublane multiple of x's dtype: 8 (f32), 16 (bf16), 32 (i8/fp8)
    sub = 8 * max(1, 4 // max(1, x_isz))

    tm = min(tile_n, n)
    if tm < n:
        tm = max(sub, (tm // sub) * sub)
    tn = f_out_p
    tk = f_in

    def vmem_bytes(tm_, tn_, tk_):
        ktiled = tk_ < f_in
        # x & output double-buffered; weight/bias single-buffered when their
        # block index is constant over the whole grid.
        w_bufs = 1 if (tn_ == f_out_p and not ktiled) else 2
        b_bufs = 1 if tn_ == f_out_p else 2
        acc = tm_ * tn_ * 4 if ktiled else 0
        return (2 * tm_ * tk_ * x_isz
                + w_bufs * tk_ * tn_ * w_isz
                + b_bufs * tn_ * 4
                + 2 * tm_ * tn_ * out_isz
                + acc)

    while vmem_bytes(tm, tn, tk) > budget and tm > 512:
        tm = max(512, ((tm // 2) // sub) * sub)
    while vmem_bytes(tm, tn, tk) > budget and tn > 128:
        tn = max(128, ((tn // 2) // 128) * 128)
    while vmem_bytes(tm, tn, tk) > budget and tm > 256:
        tm = max(256, ((tm // 2) // sub) * sub)
    while (vmem_bytes(tm, tn, tk) > budget
           and tk % 2 == 0 and (tk // 2) % 128 == 0):
        tk //= 2
    return tm, tn, tk


def _spec(shape, index_map, single_buffer=False):
    """BlockSpec; resident (constant-index) operands get a single buffer."""
    if single_buffer:
        try:
            return pl.BlockSpec(shape, index_map, pipeline_mode=pl.Buffered(1))
        except TypeError:   # older BlockSpec signature without pipeline_mode
            pass
    return pl.BlockSpec(shape, index_map)


@functools.partial(jax.jit,
                   static_argnames=("tile_n", "out_dtype", "return_padded"))
def deepset_forward(x, weight, bias, edge_index=None, edge_weight=None, *,
                    tile_n=1024, out_dtype=None, return_padded=False):
    """DeepSet forward: y = x @ weight.T + bias.

    edge_index / edge_weight are accepted but ignored, exactly like the module.

    x:      [N, F_in]   — never cast or padded by the wrapper (pass bf16 x and
                          weight for half the matmul-operand HBM traffic).
    weight: [F_out, F_in] (torch.nn.Linear layout).
    bias:   [F_out].
    out_dtype: store dtype (default x.dtype); accumulation is always f32.
    return_padded: return [N, round_up(F_out, 128)] and skip the post-slice
                   copy (use when the consumer fuses / ignores the zero cols).
    """
    n, f_in = x.shape
    f_out = weight.shape[0]
    out_dtype = x.dtype if out_dtype is None else jnp.dtype(out_dtype)

    # ---- one-time wrapper glue on the SMALL operands only -------------------
    # Pre-transpose the weight to [F_in, F_out] (MXU-native, no in-kernel
    # vxpose), match x's dtype (avoid a mixed-precision dot), and zero-pad
    # F_out to a lane-dense multiple of 128 (full unmasked output stores).
    f_out_p = _round_up(f_out, 128)
    w_t = weight.astype(x.dtype).T                       # [F_in, F_out]
    b_f32 = bias.astype(jnp.float32)
    if f_out_p != f_out:
        w_t = jnp.pad(w_t, ((0, 0), (0, f_out_p - f_out)))
        b_f32 = jnp.pad(b_f32, (0, f_out_p - f_out))
    b2 = b_f32.reshape(1, f_out_p)

    x_isz = jnp.dtype(x.dtype).itemsize
    w_isz = jnp.dtype(w_t.dtype).itemsize
    out_isz = jnp.dtype(out_dtype).itemsize

    budget, vmem_limit = _vmem_plan()
    tm, tn, tk = _fit_tiles(n, f_in, f_out_p, x_isz, w_isz, out_isz,
                            tile_n, budget)

    gi = pl.cdiv(n, tm)          # node blocks    (leading -> megacore shards N)
    gj = pl.cdiv(f_out_p, tn)    # F_out blocks   (inner  -> x tile resident)
    gk = pl.cdiv(f_in, tk)       # F_in blocks    (innermost, reduction)

    # Advisory cost estimate that matches the actual re-read traffic.
    x_reads = gj                                   # x re-streamed per F_out block
    w_reads = gi if (gj > 1 or gk > 1) else 1      # weight re-streamed per node block
    cost = pl.CostEstimate(
        flops=2 * n * f_in * f_out_p,
        bytes_accessed=(x_reads * n * f_in * x_isz
                        + w_reads * f_out_p * f_in * w_isz
                        + f_out_p * 4
                        + n * f_out_p * out_isz),
        transcendentals=0,
    )

    w_resident = (gj == 1 and gk == 1)   # weight block index constant over grid
    b_resident = (gj == 1)               # bias block index constant over grid

    if gk == 1:
        grid_spec = pltpu.PrefetchScalarGridSpec(
            num_scalar_prefetch=0,
            grid=(gi, gj),
            in_specs=[
                pl.BlockSpec((tm, f_in), lambda i, j: (i, 0)),        # x
                _spec((f_in, tn), lambda i, j: (0, j), w_resident),   # weight
                _spec((1, tn), lambda i, j: (0, j), b_resident),      # bias
            ],
            out_specs=pl.BlockSpec((tm, tn), lambda i, j: (i, j)),
        )
        kernel = _linear_kernel
        semantics = ("parallel", "parallel")
    else:
        grid_spec = pltpu.PrefetchScalarGridSpec(
            num_scalar_prefetch=0,
            grid=(gi, gj, gk),
            in_specs=[
                pl.BlockSpec((tm, tk), lambda i, j, k: (i, k)),       # x
                pl.BlockSpec((tk, tn), lambda i, j, k: (k, j)),       # weight
                _spec((1, tn), lambda i, j, k: (0, j), b_resident),   # bias
            ],
            out_specs=pl.BlockSpec((tm, tn), lambda i, j, k: (i, j)),
            scratch_shapes=[pltpu.VMEM((tm, tn), jnp.float32)],
        )
        kernel = _linear_kernel_ktiled
        semantics = ("parallel", "parallel", "arbitrary")

    y_p = pl.pallas_call(
        kernel,
        out_shape=jax.ShapeDtypeStruct((n, f_out_p), out_dtype),
        grid_spec=grid_spec,
        compiler_params=pltpu.CompilerParams(
            dimension_semantics=semantics,
            vmem_limit_bytes=vmem_limit,
        ),
        cost_estimate=cost,
    )(x, w_t, b2)

    if return_padded or f_out_p == f_out:
        return y_p
    # TODO(synk): this narrow slice is an extra XLA pass over the output; pass
    # return_padded=True when the consumer can fuse / ignore the zero columns.
    return y_p[:, :f_out]


if __name__ == "__main__":
    key = jax.random.PRNGKey(0)
    k_x, k_w, k_b = jax.random.split(key, 3)

    # Small, module-consistent shapes: N nodes, F_in features -> F_out.
    N, F_IN, F_OUT = 128, 64, 32

    x = jax.random.normal(k_x, (N, F_IN), dtype=jnp.float32)
    # torch.nn.Linear(F_IN, F_OUT)-shaped parameters.
    weight = jax.random.normal(k_w, (F_OUT, F_IN), dtype=jnp.float32) * 0.1
    bias = jax.random.normal(k_b, (F_OUT,), dtype=jnp.float32) * 0.1

    # Dummy graph structure — unused by the forward pass, matching the module.
    edge_index = jnp.zeros((2, 16), dtype=jnp.int32)

    y_ref = x @ weight.T + bias

    # Exact f32 path.
    y = jax.block_until_ready(deepset_forward(x, weight, bias, edge_index))
    assert y.shape == (N, F_OUT)
    assert jnp.allclose(y, y_ref, atol=1e-5, rtol=1e-5)

    # Bandwidth path: producer already emits bf16 (the wrapper never casts x);
    # f32 accumulation + f32 output epilogue (v5e-friendly), loose tolerance.
    y_bf16 = jax.block_until_ready(
        deepset_forward(x.astype(jnp.bfloat16), weight.astype(jnp.bfloat16),
                        bias, edge_index, out_dtype=jnp.float32))
    assert y_bf16.shape == (N, F_OUT)
    assert jnp.allclose(y_bf16, y_ref, atol=5e-2, rtol=5e-2)

    print("KERNEL_OK")
</pallas_src>

<mosaic_0001>
module attributes {stable_mosaic.version = 11 : i64} {
  func.func @_linear_kernel(%arg0: i32, %arg1: i32, %arg2: memref<128x64xf32, #tpu.memory_space<vmem>>, %arg3: memref<64x128xf32, #tpu.memory_space<vmem>>, %arg4: memref<1x128xf32, #tpu.memory_space<vmem>>, %arg5: memref<128x128xf32, #tpu.memory_space<vmem>>) attributes {dimension_semantics = [#tpu.dimension_semantics<parallel>, #tpu.dimension_semantics<parallel>], iteration_bounds = array<i64: 1, 1>, scalar_prefetch = 0 : i64, scratch_operands = 0 : i64, tpu.core_type = #tpu.core_type<tc>, window_params = [{transform_indices = @transform_0, window_bounds = array<i64: 128, 64>}, {pipeline_mode = #tpu.pipeline_mode<synchronous>, transform_indices = @transform_1, window_bounds = array<i64: 64, 128>}, {pipeline_mode = #tpu.pipeline_mode<synchronous>, transform_indices = @transform_2, window_bounds = array<i64: 1, 128>}, {transform_indices = @transform_3, window_bounds = array<i64: 128, 128>}]} {
    %c0 = arith.constant 0 : index
    %c0_0 = arith.constant 0 : index
    %0 = vector.load %arg2[%c0, %c0_0] : memref<128x64xf32, #tpu.memory_space<vmem>>, vector<128x64xf32>
    %c0_1 = arith.constant 0 : index
    %c0_2 = arith.constant 0 : index
    %1 = vector.load %arg3[%c0_1, %c0_2] : memref<64x128xf32, #tpu.memory_space<vmem>>, vector<64x128xf32>
    %cst = arith.constant dense<0.000000e+00> : vector<128x128xf32>
    %2 = tpu.matmul %0, %1, %cst {dimension_numbers = #tpu.dot_dimension_numbers<[1], [0], [0], [1], [0, 0, 1, 1], [], []>} : vector<128x64xf32>, vector<64x128xf32>, vector<128x128xf32> -> vector<128x128xf32>
    %c0_3 = arith.constant 0 : index
    %c0_4 = arith.constant 0 : index
    %3 = vector.load %arg4[%c0_3, %c0_4] : memref<1x128xf32, #tpu.memory_space<vmem>>, vector<1x128xf32>
    %4 = vector.broadcast %3 : vector<1x128xf32> to vector<128x128xf32>
    %5 = arith.addf %2, %4 : vector<128x128xf32>
    %c0_5 = arith.constant 0 : index
    %c0_6 = arith.constant 0 : index
    %6 = vector.load %arg5[%c0_5, %c0_6] : memref<128x128xf32, #tpu.memory_space<vmem>>, vector<128x128xf32>
    tpu.vector_store %arg5[%c0_5, %c0_6], %5 {strides = array<i32>} : memref<128x128xf32, #tpu.memory_space<vmem>>, vector<128x128xf32>,
    return
  }
  func.func @transform_0(%arg0: i32, %arg1: i32) -> (i32, i32) {
    %c0_i32 = arith.constant 0 : i32
    %c0_i32_0 = arith.constant 0 : i32
    return %arg0, %c0_i32 : i32, i32
  }
  func.func @transform_1(%arg0: i32, %arg1: i32) -> (i32, i32) {
    %c0_i32 = arith.constant 0 : i32
    %c0_i32_0 = arith.constant 0 : i32
    return %c0_i32, %arg1 : i32, i32
  }
  func.func @transform_2(%arg0: i32, %arg1: i32) -> (i32, i32) {
    %c0_i32 = arith.constant 0 : i32
    %c0_i32_0 = arith.constant 0 : i32
    return %c0_i32, %arg1 : i32, i32
  }
  func.func @transform_3(%arg0: i32, %arg1: i32) -> (i32, i32) {
    %c0_i32 = arith.constant 0 : i32
    return %arg0, %arg1 : i32, i32
  }
}

</mosaic_0001>

<bundles_post_ra>
// kernel: deepset_forward.1
= control target key start
LH: loop header
LB: loop body
LE: loop exit
PB: predicated region body
PF: predicated region fallthrough
CT: control target
= control target key end

     0   :  { %vm45_vm0 = vcmask 523264   ;;  %s523_s1 = inlined_call_operand.vmem [shape: f32[64,128], index: 1, kind: input, shape index: {}]   ;;  %s524_s0 = inlined_call_operand.vmem [shape: f32[128,64], index: 0, kind: input, shape index: {}]   ;;  %s525_s2 = inlined_call_operand.vmem [shape: f32[1,128], index: 2, kind: input, shape index: {}]   ;;  %s526_s3 = inlined_call_operand.vmem [shape: f32[128,128], index: 3, kind: output, shape index: {}]  }
   0x1   :  { %v30_v0 = vld [vmem:[%s523_s1] sm:$0xff]  ;;  %v31_v1 = vld [vmem:[%s523_s1 + $0x8] sm:$0xff]  ;;  %v32_v2 = vld [vmem:[%s523_s1 + $0x10] sm:$0xff] }
   0x2   :  { %v340_v3 = vpack.c.bf16 %v31_v1, %v30_v0  ;;  %v33_v4 = vld [vmem:[%s523_s1 + $0x18] sm:$0xff]  ;;  %v34_v6 = vld [vmem:[%s523_s1 + $0x20] sm:$0xff]  ;;  %v35_v7 = vld [vmem:[%s523_s1 + $0x28] sm:$0xff] }
   0x3   :  { %v344_v5 = vpack.c.bf16 %v33_v4, %v32_v2  ;;  %v14_v8 = vld [vmem:[%s524_s0] sm:$0xff]  ;;  %v348_v10 = vpack.c.bf16 %v35_v7, %v34_v6  ;;  %v36_v11 = vld [vmem:[%s523_s1 + $0x30] sm:$0xff]  ;;  %v37_v12 = vld [vmem:[%s523_s1 + $0x38] sm:$0xff] }
   0x4   :  { %341 = vmatprep.subr.bf16.mxu0 %v340_v3  ;;  %356 = vmatprep.subr.bf16.mxu1 %v340_v3  ;;  %v22_v9 = vld [vmem:[%s524_s0 + $0x40] sm:$0xff]  ;;  %v352_v13 = vpack.c.bf16 %v37_v12, %v36_v11  ;;  %v15_v14 = vld [vmem:[%s524_s0 + $0x8] sm:$0xff]  ;;  %v16_v16 = vld [vmem:[%s524_s0 + $0x10] sm:$0xff] }
   0x5   :  { %343 = vmatpush3.bf16.msra.mxu0 %v340_v3  ;;  %360 = vmatpush3.bf16.msra.mxu1 %v340_v3  ;;  %v23_v15 = vld [vmem:[%s524_s0 + $0x48] sm:$0xff]  ;;  %v24_v17 = vld [vmem:[%s524_s0 + $0x50] sm:$0xff]  ;;  %v17_v18 = vld [vmem:[%s524_s0 + $0x18] sm:$0xff] }
   0x6   :  { %345 = vmatprep.subr.bf16.mxu0 %v344_v5  ;;  %357 = vmatprep.subr.bf16.mxu1 %v344_v5  ;;  %v25_v19 = vld [vmem:[%s524_s0 + $0x58] sm:$0xff]  ;;  %v18_v20 = vld [vmem:[%s524_s0 + $0x20] sm:$0xff]  ;;  %v19_v22 = vld [vmem:[%s524_s0 + $0x28] sm:$0xff] }
   0x7   :  { %316 = vmatprep.mubr.msk.f32.mxu0 %vm45_vm0, %v14_v8  ;;  %328 = vmatprep.mubr.msk.f32.mxu1 %vm45_vm0, %v22_v9  ;;  %v26_v21 = vld [vmem:[%s524_s0 + $0x60] sm:$0xff]  ;;  %v27_v23 = vld [vmem:[%s524_s0 + $0x68] sm:$0xff]  ;;  %v20_v24 = vld [vmem:[%s524_s0 + $0x30] sm:$0xff] }
   0x8   :  { %v28_v25 = vld [vmem:[%s524_s0 + $0x70] sm:$0xff]  ;;  %v21_v26 = vld [vmem:[%s524_s0 + $0x38] sm:$0xff]  ;;  %v259_v28 = vld [vmem:[%s525_s2] ss:$0 sm:$0xff] }
   0x9   :  { %347 = vmatpush3.bf16.msra.mxu0 %v344_v5  ;;  %361 = vmatpush3.bf16.msra.mxu1 %v344_v5  ;;  %v29_v27 = vld [vmem:[%s524_s0 + $0x78] sm:$0xff] }
   0xa   :  { %349 = vmatprep.subr.bf16.mxu0 %v348_v10  ;;  %358 = vmatprep.subr.bf16.mxu1 %v348_v10 }
   0xd   :  { %351 = vmatpush3.bf16.msra.mxu0 %v348_v10  ;;  %362 = vmatpush3.bf16.msra.mxu1 %v348_v10 }
   0xe   :  { %353 = vmatprep.subr.bf16.mxu0 %v352_v13  ;;  %359 = vmatprep.subr.bf16.mxu1 %v352_v13 }
  0x11   :  { %355 = vmatpush3.bf16.msra.mxu0 %v352_v13  ;;  %363 = vmatpush3.bf16.msra.mxu1 %v352_v13 }
  0x14   :  { %317 = vmatmul.mubr.msk.f32.vlgmr.msra.gmra.mrb[0].mxu0 %vm45_vm0, %v15_v14  ;;  %329 = vmatmul.mubr.msk.f32.vlgmr.msra.gmra.mrb[0].mxu1 %vm45_vm0, %v23_v15 }
  0x15   :  { %319 = vmatprep.mubr.msk.f32.mxu0 %vm45_vm0, %v16_v16  ;;  %331 = vmatprep.mubr.msk.f32.mxu1 %vm45_vm0, %v24_v17 }
  0x18   :  { %320 = vmatmul.mubr.msk.f32.gmra.mrb[2].mxu0 %vm45_vm0, %v17_v18  ;;  %332 = vmatmul.mubr.msk.f32.gmra.mrb[2].mxu1 %vm45_vm0, %v25_v19 }
  0x19   :  { %322 = vmatprep.mubr.msk.f32.mxu0 %vm45_vm0, %v18_v20  ;;  %334 = vmatprep.mubr.msk.f32.mxu1 %vm45_vm0, %v26_v21 }
  0x1c   :  { %323 = vmatmul.mubr.msk.f32.gmra.mrb[4].mxu0 %vm45_vm0, %v19_v22  ;;  %335 = vmatmul.mubr.msk.f32.gmra.mrb[4].mxu1 %vm45_vm0, %v27_v23 }
  0x1d   :  { %325 = vmatprep.mubr.msk.f32.mxu0 %vm45_vm0, %v20_v24  ;;  %337 = vmatprep.mubr.msk.f32.mxu1 %vm45_vm0, %v28_v25 }
  0x20   :  { %326 = vmatmul.mubr.msk.f32.gmra.mrb[6].mxu0 %vm45_vm0, %v21_v26  ;;  %338 = vmatmul.mubr.msk.f32.gmra.mrb[6].mxu1 %vm45_vm0, %v29_v27 }
  0xe7   :  { %v318_v29 = vpop.f32.mrb[0].mxu0  ;;  %v330_v30 = vpop.f32.mrb[0].mxu1 }
  0xe8   :  { %v166_v31 = vadd.f32 %v318_v29, %v259_v28  ;;  %v206_v32 = vadd.f32 %v330_v30, %v259_v28  ;;  %v160_v33 = vpop.f32.mrb[1].mxu0  ;;  %v200_v34 = vpop.f32.mrb[1].mxu1 }
  0xe9   :  { %v161_v35 = vadd.f32 %v259_v28, %v160_v33  ;;  %v201_v36 = vadd.f32 %v259_v28, %v200_v34 }
  0xea   :  { %240 = vst [vmem:[%s526_s3 + $0x8] sm:$0xff] %v166_v31  ;;  %248 = vst [vmem:[%s526_s3 + $0x48] sm:$0xff] %v206_v32 }
  0xeb   :  { %239 = vst [vmem:[%s526_s3] sm:$0xff] %v161_v35  ;;  %247 = vst [vmem:[%s526_s3 + $0x40] sm:$0xff] %v201_v36  ;;  %v321_v37 = vpop.f32.mrb[2].mxu0  ;;  %v333_v38 = vpop.f32.mrb[2].mxu1 }
  0xec   :  { %v176_v39 = vadd.f32 %v321_v37, %v259_v28  ;;  %v216_v40 = vadd.f32 %v333_v38, %v259_v28  ;;  %v170_v41 = vpop.f32.mrb[3].mxu0  ;;  %v210_v42 = vpop.f32.mrb[3].mxu1 }
  0xed   :  { %v171_v43 = vadd.f32 %v259_v28, %v170_v41  ;;  %v211_v44 = vadd.f32 %v259_v28, %v210_v42 }
  0xee   :  { %242 = vst [vmem:[%s526_s3 + $0x18] sm:$0xff] %v176_v39  ;;  %250 = vst [vmem:[%s526_s3 + $0x58] sm:$0xff] %v216_v40 }
  0xef   :  { %241 = vst [vmem:[%s526_s3 + $0x10] sm:$0xff] %v171_v43  ;;  %249 = vst [vmem:[%s526_s3 + $0x50] sm:$0xff] %v211_v44  ;;  %v324_v45 = vpop.f32.mrb[4].mxu0  ;;  %v336_v46 = vpop.f32.mrb[4].mxu1 }
  0xf0   :  { %v186_v47 = vadd.f32 %v324_v45, %v259_v28  ;;  %v226_v48 = vadd.f32 %v336_v46, %v259_v28  ;;  %v180_v49 = vpop.f32.mrb[5].mxu0  ;;  %v220_v50 = vpop.f32.mrb[5].mxu1 }
  0xf1   :  { %v181_v51 = vadd.f32 %v259_v28, %v180_v49  ;;  %v221_v52 = vadd.f32 %v259_v28, %v220_v50 }
  0xf2   :  { %244 = vst [vmem:[%s526_s3 + $0x28] sm:$0xff] %v186_v47  ;;  %252 = vst [vmem:[%s526_s3 + $0x68] sm:$0xff] %v226_v48 }
  0xf3   :  { %243 = vst [vmem:[%s526_s3 + $0x20] sm:$0xff] %v181_v51  ;;  %251 = vst [vmem:[%s526_s3 + $0x60] sm:$0xff] %v221_v52  ;;  %v327_v53 = vpop.f32.mrb[6].mxu0  ;;  %v339_v54 = vpop.f32.mrb[6].mxu1 }
  0xf4   :  { %v196_v55 = vadd.f32 %v327_v53, %v259_v28  ;;  %v236_v56 = vadd.f32 %v339_v54, %v259_v28  ;;  %v190_v57 = vpop.f32.mrb[7].mxu0  ;;  %v230_v58 = vpop.f32.mrb[7].mxu1 }
  0xf5   :  { %v191_v59 = vadd.f32 %v259_v28, %v190_v57  ;;  %v231_v60 = vadd.f32 %v259_v28, %v230_v58 }
  0xf6   :  { %246 = vst [vmem:[%s526_s3 + $0x38] sm:$0xff] %v196_v55  ;;  %254 = vst [vmem:[%s526_s3 + $0x78] sm:$0xff] %v236_v56 }
  0xf7   :  { %245 = vst [vmem:[%s526_s3 + $0x30] sm:$0xff] %v191_v59  ;;  %253 = vst [vmem:[%s526_s3 + $0x70] sm:$0xff] %v231_v60 }

</bundles_post_ra>
